<compile_context>
chip_gen: v7x
topology: tpu7x:2x2x1
jax: 0.10.0
libtpu: 0.0.40
codegen_flags: <defaults>
</compile_context>

<pallas_src>
import jax
import jax.numpy as jnp
from jax.experimental import pallas as pl
from jax.experimental.pallas import tpu as pltpu


def transpose_conv2d(x_nchw, weight, bias, stride, padding):
    """PyTorch nn.ConvTranspose2d forward.

    x_nchw: (N, Cin, H, W)   weight: (Cin, Cout, K, K)   bias: (Cout,)
    returns (N, Cout, Ho, Wo) with Ho = (H-1)*stride - 2*padding + K.
    """
    N, Cin, H, W = x_nchw.shape
    Cin_w, Cout, K, K2 = weight.shape
    assert Cin == Cin_w and K == K2

    # ---------- glue: transposed conv -> stride-1 correlation ----------
    x = jnp.transpose(x_nchw, (0, 2, 3, 1))  # NHWC
    if stride > 1:
        # TODO(synk): fold the stride dilation into the Toeplitz weight / index
        # math instead of materializing a zero-dilated tensor in HBM.
        Hd, Wd = (H - 1) * stride + 1, (W - 1) * stride + 1
        xd = jnp.zeros((N, Hd, Wd, Cin), x.dtype)
        xd = xd.at[:, ::stride, ::stride, :].set(x)
    else:
        Hd, Wd = H, W
        xd = x
    pe = K - 1 - padding
    assert pe >= 0, "kernel_size - 1 - padding must be >= 0"
    xp = jnp.pad(xd, ((0, 0), (pe, pe), (pe, pe), (0, 0)))
    Hp, Wp = Hd + 2 * pe, Wd + 2 * pe
    Ho, Wo = Hp - K + 1, Wp - K + 1

    # Flipped + channel-swapped weight taps: wf[kh, kw, ci, co].
    wf = jnp.flip(weight, axis=(2, 3)).transpose(2, 3, 0, 1)  # (K, K, Cin, Cout)

    # Toeplitz expansion along W: Wb[kh, w_in*Cin+ci, wo*Cout+co]
    #   = wf[kh, w_in - wo, ci, co] if 0 <= w_in - wo < K else 0.
    shift = (jnp.arange(Wp)[None, :, None]
             == (jnp.arange(Wo)[None, None, :] + jnp.arange(K)[:, None, None])
             ).astype(weight.dtype)                              # (K, Wp, Wo)
    Wb = jnp.einsum('xpw,yxic->ypiwc', shift, wf)                # (K,Wp,Cin,Wo,Cout)
    WpC, WoCo = Wp * Cin, Wo * Cout
    Wb = Wb.reshape(K, WpC, WoCo)

    # Bias flattened to the (wo*Cout + co) output layout.
    b_flat = jnp.tile(bias.astype(jnp.float32), (Wo,)).reshape(1, WoCo)

    # Padded input with (W, Cin) flattened onto the lane axis.
    xp_flat = xp.reshape(N, Hp, WpC)

    # ---------- H tiling (halo of K-1 rows per tile) ----------
    if Ho <= 256:
        TH = Ho
    else:
        TH = next(t for t in (256, 192, 128, 64, 32, 16, 8, 4, 2, 1)
                  if Ho % t == 0)
    nHt = Ho // TH
    HH = TH + K - 1
    if nHt == 1:
        x_tiles = xp_flat[:, None, :, :]                         # (N,1,Hp,WpC)
    else:
        x_tiles = jnp.stack(
            [xp_flat[:, i * TH:i * TH + HH, :] for i in range(nHt)], axis=1)

    # ---------- Pallas kernel ----------
    def kernel(x_ref, w_ref, b_ref, o_ref):
        # x_ref: (TH+K-1, WpC)  w_ref: (K, WpC, WoCo)  b_ref: (1, WoCo)
        # o_ref: (TH, WoCo)
        acc = jnp.dot(x_ref[0:TH, :], w_ref[0],
                      preferred_element_type=jnp.float32)
        for kh in range(1, K):
            acc = acc + jnp.dot(x_ref[kh:kh + TH, :], w_ref[kh],
                                preferred_element_type=jnp.float32)
        o_ref[...] = (acc + b_ref[...]).astype(o_ref.dtype)

    flops = 2 * N * nHt * K * TH * WpC * WoCo
    bytes_accessed = 4 * (x_tiles.size + Wb.size + b_flat.size
                          + N * nHt * TH * WoCo)

    out_tiles = pl.pallas_call(
        kernel,
        out_shape=jax.ShapeDtypeStruct((N, nHt, TH, WoCo), x.dtype),
        grid_spec=pltpu.PrefetchScalarGridSpec(
            num_scalar_prefetch=0,
            grid=(N, nHt),
            in_specs=[
                pl.BlockSpec((None, None, HH, WpC), lambda n, h: (n, h, 0, 0)),
                pl.BlockSpec((K, WpC, WoCo), lambda n, h: (0, 0, 0)),
                pl.BlockSpec((1, WoCo), lambda n, h: (0, 0)),
            ],
            out_specs=pl.BlockSpec((None, None, TH, WoCo),
                                   lambda n, h: (n, h, 0, 0)),
        ),
        compiler_params=pltpu.CompilerParams(
            dimension_semantics=("parallel", "parallel"),
            vmem_limit_bytes=32 * 1024 * 1024),
        cost_estimate=pl.CostEstimate(flops=flops, transcendentals=0,
                                      bytes_accessed=bytes_accessed),
    )(x_tiles, Wb, b_flat)

    out = out_tiles.reshape(N, Ho, Wo, Cout)
    return jnp.transpose(out, (0, 3, 1, 2))  # NCHW


def ref_transpose_conv2d(x, weight, bias, stride, padding):
    """Pure-JAX reference (conv-transpose <-> dilated-conv identity)."""
    Cin, Cout, K, _ = weight.shape
    wf = jnp.flip(weight, axis=(2, 3)).transpose(1, 0, 2, 3)  # (Cout, Cin, K, K)
    pe = K - 1 - padding
    out = jax.lax.conv_general_dilated(
        x, wf, window_strides=(1, 1),
        padding=((pe, pe), (pe, pe)),
        lhs_dilation=(stride, stride),
        dimension_numbers=("NCHW", "OIHW", "NCHW"))
    return out + bias[None, :, None, None]


if __name__ == "__main__":
    # Module config (matches TransposeConv(__init__) with padding='same'):
    input_size = 16
    n_channels_in = 4
    n_channels_out = 8
    kernel_size = 3
    stride = 1
    pad_f = 0.5 * ((input_size - 1) * stride + kernel_size - input_size)
    assert pad_f == int(pad_f), "'same' padding must be integral for this config"
    padding = int(pad_f)  # = 1

    key = jax.random.PRNGKey(0)
    kx, kw, kb = jax.random.split(key, 3)
    x = jax.random.normal(kx, (2, n_channels_in, input_size, input_size),
                          dtype=jnp.float32)
    # ConvTranspose2d weight shape: (in_channels, out_channels, K, K)
    weight = 0.1 * jax.random.normal(
        kw, (n_channels_in, n_channels_out, kernel_size, kernel_size),
        dtype=jnp.float32)
    bias = 0.1 * jax.random.normal(kb, (n_channels_out,), dtype=jnp.float32)

    out = transpose_conv2d(x, weight, bias, stride, padding)
    out = jax.block_until_ready(out)

    ref = ref_transpose_conv2d(x, weight, bias, stride, padding)
    assert out.shape == (2, n_channels_out, input_size, input_size), out.shape
    assert jnp.allclose(out, ref, atol=1e-4, rtol=1e-4), \
        float(jnp.max(jnp.abs(out - ref)))

    print("KERNEL_OK")
</pallas_src>

<mosaic_0001>
module attributes {stable_mosaic.version = 11 : i64} {
  func.func @kernel(%arg0: i32, %arg1: i32, %arg2: memref<1x1x18x72xf32, #tpu.memory_space<vmem>>, %arg3: memref<3x72x128xf32, #tpu.memory_space<vmem>>, %arg4: memref<1x128xf32, #tpu.memory_space<vmem>>, %arg5: memref<1x1x16x128xf32, #tpu.memory_space<vmem>>) attributes {dimension_semantics = [#tpu.dimension_semantics<parallel>, #tpu.dimension_semantics<parallel>], iteration_bounds = array<i64: 2, 1>, scalar_prefetch = 0 : i64, scratch_operands = 0 : i64, tpu.core_type = #tpu.core_type<tc>, window_params = [{transform_indices = @transform_0, window_bounds = array<i64: 1, 1, 18, 72>}, {pipeline_mode = #tpu.pipeline_mode<synchronous>, transform_indices = @transform_1, window_bounds = array<i64: 3, 72, 128>}, {pipeline_mode = #tpu.pipeline_mode<synchronous>, transform_indices = @transform_2, window_bounds = array<i64: 1, 128>}, {transform_indices = @transform_3, window_bounds = array<i64: 1, 1, 16, 128>}]} {
    %c0 = arith.constant 0 : index
    %c0_0 = arith.constant 0 : index
    %c0_1 = arith.constant 0 : index
    %c0_2 = arith.constant 0 : index
    %0 = vector.load %arg2[%c0, %c0_0, %c0_1, %c0_2] : memref<1x1x18x72xf32, #tpu.memory_space<vmem>>, vector<1x1x16x72xf32>
    %1 = vector.shape_cast %0 : vector<1x1x16x72xf32> to vector<16x72xf32>
    %c0_3 = arith.constant 0 : index
    %c0_4 = arith.constant 0 : index
    %c0_5 = arith.constant 0 : index
    %2 = vector.load %arg3[%c0_3, %c0_4, %c0_5] : memref<3x72x128xf32, #tpu.memory_space<vmem>>, vector<1x72x128xf32>
    %3 = vector.shape_cast %2 : vector<1x72x128xf32> to vector<72x128xf32>
    %cst = arith.constant dense<0.000000e+00> : vector<16x128xf32>
    %4 = tpu.matmul %1, %3, %cst {dimension_numbers = #tpu.dot_dimension_numbers<[1], [0], [0], [1], [0, 0, 1, 1], [], []>} : vector<16x72xf32>, vector<72x128xf32>, vector<16x128xf32> -> vector<16x128xf32>
    %c0_6 = arith.constant 0 : index
    %c0_7 = arith.constant 0 : index
    %c1 = arith.constant 1 : index
    %c0_8 = arith.constant 0 : index
    %5 = vector.load %arg2[%c0_6, %c0_7, %c1, %c0_8] : memref<1x1x18x72xf32, #tpu.memory_space<vmem>>, vector<1x1x16x72xf32>
    %6 = vector.shape_cast %5 : vector<1x1x16x72xf32> to vector<16x72xf32>
    %c1_9 = arith.constant 1 : index
    %c0_10 = arith.constant 0 : index
    %c0_11 = arith.constant 0 : index
    %7 = vector.load %arg3[%c1_9, %c0_10, %c0_11] : memref<3x72x128xf32, #tpu.memory_space<vmem>>, vector<1x72x128xf32>
    %8 = vector.shape_cast %7 : vector<1x72x128xf32> to vector<72x128xf32>
    %cst_12 = arith.constant dense<0.000000e+00> : vector<16x128xf32>
    %9 = tpu.matmul %6, %8, %cst_12 {dimension_numbers = #tpu.dot_dimension_numbers<[1], [0], [0], [1], [0, 0, 1, 1], [], []>} : vector<16x72xf32>, vector<72x128xf32>, vector<16x128xf32> -> vector<16x128xf32>
    %10 = arith.addf %4, %9 : vector<16x128xf32>
    %c0_13 = arith.constant 0 : index
    %c0_14 = arith.constant 0 : index
    %c2 = arith.constant 2 : index
    %c0_15 = arith.constant 0 : index
    %11 = vector.load %arg2[%c0_13, %c0_14, %c2, %c0_15] : memref<1x1x18x72xf32, #tpu.memory_space<vmem>>, vector<1x1x16x72xf32>
    %12 = vector.shape_cast %11 : vector<1x1x16x72xf32> to vector<16x72xf32>
    %c2_16 = arith.constant 2 : index
    %c0_17 = arith.constant 0 : index
    %c0_18 = arith.constant 0 : index
    %13 = vector.load %arg3[%c2_16, %c0_17, %c0_18] : memref<3x72x128xf32, #tpu.memory_space<vmem>>, vector<1x72x128xf32>
    %14 = vector.shape_cast %13 : vector<1x72x128xf32> to vector<72x128xf32>
    %cst_19 = arith.constant dense<0.000000e+00> : vector<16x128xf32>
    %15 = tpu.matmul %12, %14, %cst_19 {dimension_numbers = #tpu.dot_dimension_numbers<[1], [0], [0], [1], [0, 0, 1, 1], [], []>} : vector<16x72xf32>, vector<72x128xf32>, vector<16x128xf32> -> vector<16x128xf32>
    %16 = arith.addf %10, %15 : vector<16x128xf32>
    %c0_20 = arith.constant 0 : index
    %c0_21 = arith.constant 0 : index
    %17 = vector.load %arg4[%c0_20, %c0_21] : memref<1x128xf32, #tpu.memory_space<vmem>>, vector<1x128xf32>
    %18 = vector.broadcast %17 : vector<1x128xf32> to vector<16x128xf32>
    %19 = arith.addf %16, %18 : vector<16x128xf32>
    %c0_22 = arith.constant 0 : index
    %c0_23 = arith.constant 0 : index
    %c0_24 = arith.constant 0 : index
    %c0_25 = arith.constant 0 : index
    %20 = vector.load %arg5[%c0_22, %c0_23, %c0_24, %c0_25] : memref<1x1x16x128xf32, #tpu.memory_space<vmem>>, vector<1x1x16x128xf32>
    %21 = vector.shape_cast %20 : vector<1x1x16x128xf32> to vector<16x128xf32>
    %22 = vector.shape_cast %19 : vector<16x128xf32> to vector<1x1x16x128xf32>
    tpu.vector_store %arg5[%c0_22, %c0_23, %c0_24, %c0_25], %22 {strides = array<i32>} : memref<1x1x16x128xf32, #tpu.memory_space<vmem>>, vector<1x1x16x128xf32>,
    return
  }
  func.func @transform_0(%arg0: i32, %arg1: i32) -> (i32, i32, i32, i32) {
    %c0_i32 = arith.constant 0 : i32
    %c0_i32_0 = arith.constant 0 : i32
    %c0_i32_1 = arith.constant 0 : i32
    return %arg0, %arg1, %c0_i32, %c0_i32_0 : i32, i32, i32, i32
  }
  func.func @transform_1(%arg0: i32, %arg1: i32) -> (i32, i32, i32) {
    %c0_i32 = arith.constant 0 : i32
    %c0_i32_0 = arith.constant 0 : i32
    %c0_i32_1 = arith.constant 0 : i32
    %c0_i32_2 = arith.constant 0 : i32
    return %c0_i32, %c0_i32_0, %c0_i32_1 : i32, i32, i32
  }
  func.func @transform_2(%arg0: i32, %arg1: i32) -> (i32, i32) {
    %c0_i32 = arith.constant 0 : i32
    %c0_i32_0 = arith.constant 0 : i32
    %c0_i32_1 = arith.constant 0 : i32
    return %c0_i32, %c0_i32_0 : i32, i32
  }
  func.func @transform_3(%arg0: i32, %arg1: i32) -> (i32, i32, i32, i32) {
    %c0_i32 = arith.constant 0 : i32
    %c0_i32_0 = arith.constant 0 : i32
    %c0_i32_1 = arith.constant 0 : i32
    return %arg0, %arg1, %c0_i32, %c0_i32_0 : i32, i32, i32, i32
  }
}

</mosaic_0001>

<bundles_post_ra>
// kernel: tpu_custom_call.1
= control target key start
LH: loop header
LB: loop body
LE: loop exit
PB: predicated region body
PF: predicated region fallthrough
CT: control target
= control target key end

     0   :  { %8 = vsyncpa [#allocation3], 0  ;;  %s1163_s0 = inlined_call_operand.vmem [shape: f32[2,1,18,72], index: 0, kind: input, shape index: {}]   ;;  %s1164_s1 = inlined_call_operand.hbm [shape: f32[3,72,128], index: 1, kind: input, shape index: {}]   ;;  %s1165_s2 = inlined_call_operand.vmem [shape: f32[1,128], index: 2, kind: input, shape index: {}]   ;;  %s1166_s3 = inlined_call_operand.hbm [shape: f32[2,1,16,128], index: 3, kind: output, shape index: {}]  }
   0x1   :  { %9 = vsyncpa [#allocation4], 0 }
   0x2   :  { %11 = vsyncpa [#allocation4 + $0x1], 0  ;;  %s993_s12 = smov 0   ;;  %s995_s13 = smov 0  }
   0x3   :  { %s997_s14 = smov 0   ;;  %s999_s15 = smov 0  }
   0x4   :  { %s1001_s16 = smov 0   ;;  %s1003_s17 = smov 0  }
   0x5 LB: > { %s614_s18 = sadd.s32 4294967295, %s965_s17   ;;  %s615_s19 = sadd.s32 4294967294, %s965_s17   ;;  %s965_s17 = sphi %s1003_s17, %s17_s17   ;;  %s961_s16 = sphi %s1001_s16, %s1184_s16   ;;  %s957_s15 = sphi %s999_s15, %s1183_s15   ;;  %s953_s14 = sphi %s997_s14, %s1182_s14   ;;  %s949_s13 = sphi %s995_s13, %s1181_s13   ;;  %s945_s12 = sphi %s993_s12, %s1180_s12  }
   0x6   : > { %s29_s20 = sadd.s32 1, %s961_s16  ;;  %s108_s21 = sadd.s32 1, %s953_s14 }
   0x7   : > { %p31_p0 = scmp.ge.s32.totalorder %s29_s20, 2  ;;  %p118_p1 = scmp.ne.s32.totalorder %s953_s14, %s949_s13 }
   0x8   : > { %p119_p2 = scmp.eq.s32.totalorder %s614_s18, 1  ;;  %p124_p3 = scmp.ne.s32.totalorder %s949_s13, %s945_s12 }
   0x9   : > { %s1186_s20 = smov (%p31_p0, %s29_s20), 0  ;;  %p125_p5 = scmp.eq.s32.totalorder %s615_s19, 1 }
   0xa   : > { %p1033_p4 = por %p119_p2, %p118_p1  ;;  %s103_s23 = ssub.s32 %s961_s16, %s1186_s20 }
   0xb   : > { %p616_p6 = scmp.ge.s32.totalorder %s965_s17, 1  ;;  %p106_p7 = scmp.eq.s32.totalorder %s103_s23, 0 }
   0xc   : > { %s1171_s22 = scalar_select %p1033_p4, 1, 0 }
   0xd   : > { %p1040_p8 = por %p125_p5, %p124_p3  ;;  %p132_p9 = scmp.lt.s32.totalorder %s965_s17, 3 }
   0xe   : > { %s1046_s25 = scalar_select %p106_p7, %s953_s14, %s108_s21  }
   0xf   : > { %s1172_s24 = scalar_select %p1040_p8, 1, 0 }
  0x10   : > { %p1048_p10 = pnand %p616_p6, %p132_p9  ;;  %p1052_p11 = scmp.eq.s32.totalorder %s614_s18, 0 }
  0x11   : > { %s967_s28 = smov [#allocation2]   ;;  %s855_s6 = scalar_lea.hbm %s1164_s1, 3456 }
  0x12   : > { %s1173_s26 = scalar_select %p1048_p10, 1, 0 }
  0x13   : > { %s1174_s27 = scalar_select %p1052_p11, 1, 0 }
  0x14   : > { %p791_p12 = pneg %p1048_p10  ;;  %s144_s29 = sshll.u32 %s967_s28, 4  ;;  %s145_s29 = int_to_ptr.vmem [resolvable:$true] %s144_s29 }
  0x15   : > { %p856_p0 = scmp.ne.s32.totalorder %s1164_s1, %s855_s6  ;;  %p862_p5 = scmp.lt.u32.totalorder %s855_s6, %s1164_s1 }
  0x16   : > { %p1060_p13 = pnand %p1052_p11, %p791_p12 }
  0x18   : > { %p857_p1 = pneg %p1060_p13 }
  0x1a   : > { %p858_p2 = pnand %p857_p1, %p856_p0 }
  0x1c   : > { %p859_p3 = pneg %p858_p2 }
  0x1e   : > { %p864_p6 = pnand %p862_p5, %p859_p3 }
  0x20   : > { %867 = shalt.err (!%p864_p6)
}
  0x21   : > { %s868_s11 = scalar_lea.vmem %s145_s29, 3456  ;;  %p876_p8 = scmp.lt.s32.totalorder %s145_s29, %s145_s29 }
  0x22   : > { %p869_p7 = scmp.ne.s32.totalorder %s145_s29, %s868_s11  ;;  %p877_p4 = scmp.lt.s32.totalorder %s868_s11, %s868_s11 }
  0x24   : > { %p871_p9 = pnand %p869_p7, %p857_p1  ;;  %p878_p11 = por %p877_p4, %p876_p8 }
  0x26   : > { %p872_p12 = pneg %p871_p9 }
  0x28   : > { %p879_p10 = pnand %p878_p11, %p872_p12 }
  0x2a   : > { %882 = shalt.err (!%p879_p10)
}
  0x2b   : > { %s968_s18 = smov 128   ;;  %s969_s19 = smov 8  }
  0x2c   : > { %794 = dma.hbm_to_vmem [thread:$0]  (!%p1060_p13), %s1164_s1, 3456, %s145_s29, [#allocation3], %s968_s18, %s968_s18, %s969_s19  }
  0x2d   : > { %p1176_p0 = scmp.ne.s32.totalorder %s1173_s26, 0 }
  0x2e   : > { %p1177_p2 = scmp.ne.s32.totalorder (!%p1176_p0), %s1174_s27, 0 }
  0x2f   : > { %175 = sbr.rel (%p1176_p0) target bundleno = 326 (0x146), region = 32 }
  0x36   : > { %936 = dma.done.wait (%p1177_p2), [#allocation3], 3456  }
  0x37   : > { %938 = vsyncadd (%p1177_p2), [#allocation3], 4294963840  ;;  %p203_p4 = scmp.lt.s32.totalorder %s957_s15, 1  ;;  %v214_v0 = vld [vmem:[#allocation2] sm:$0xff]  ;;  %v215_v1 = vld [vmem:[#allocation2 + $0x8] sm:$0xff]  ;;  %vm235_vm0 = vcmask 588800  }
  0x38   : > { %v216_v2 = vld [vmem:[#allocation2 + $0x10] sm:$0xff]  ;;  %v748_v3 = vpack.c.bf16 %v215_v1, %v214_v0  ;;  %v217_v4 = vld [vmem:[#allocation2 + $0x18] sm:$0xff]  ;;  %v218_v6 = vld [vmem:[#allocation2 + $0x20] sm:$0xff]  ;;  %s200_s26 = sand.u32 1, %s949_s13   ;;  %s635_s10 = sshll.u32 %s957_s15, 8 }
  0x39   : > { %s204_s28 = scalar_select %p203_p4, %s957_s15, 1  ;;  %v752_v5 = vpack.c.bf16 %v217_v4, %v216_v2  ;;  %v219_v7 = vld [vmem:[#allocation2 + $0x28] sm:$0xff]  ;;  %v227_v9 = vld [vmem:[#allocation2 + $0x50] sm:$0xff]  ;;  %v228_v14 = vld [vmem:[#allocation2 + $0x58] sm:$0xff] }
  0x3a   : > { %749 = vmatprep.subr.bf16.mxu0 %v748_v3  ;;  %v226_v8 = vld [vmem:[#allocation2 + $0x48] sm:$0xff]  ;;  %v756_v12 = vpack.c.bf16 %v219_v7, %v218_v6  ;;  %v220_v13 = vld [vmem:[#allocation2 + $0x30] sm:$0xff]  ;;  %v229_v15 = vld [vmem:[#allocation2 + $0x60] sm:$0xff]  ;;  %s621_s27 = sshll.u32 %s200_s26, 4  ;;  %s1115_s19 = scalar_lea.hbm %s1166_s3, %s635_s10 }
  0x3b   : > { %s784_s4 = smul.u32 24, %s204_s28  ;;  %751 = vmatpush3.bf16.msra.mxu0 %v748_v3  ;;  %v732_v11 = vpack.c.bf16 %v227_v9, %v226_v8  ;;  %v221_v16 = vld [vmem:[#allocation2 + $0x38] sm:$0xff]  ;;  %v736_v17 = vpack.c.bf16 %v229_v15, %v228_v14  ;;  %v230_v18 = vld [vmem:[#allocation2 + $0x68] sm:$0xff]  ;;  %v231_v19 = vld [vmem:[#allocation2 + $0x70] sm:$0xff]  ;;  %s202_s8 = scalar_lea.vmem [#allocation5], %s621_s27 }
  0x3c   : > { %753 = vmatprep.subr.bf16.mxu0 %v752_v5  ;;  %v740_v20 = vpack.c.bf16 %v231_v19, %v230_v18  ;;  %v760_v21 = vpack.c.bf16 %v221_v16, %v220_v13  ;;  %v232_v22 = vld [vmem:[#allocation2 + $0x78] sm:$0xff]  ;;  %v233_v23 = vld [vmem:[#allocation2 + $0x80] sm:$0xff]  ;;  %v401_v27 = vld [vmem:[#allocation2 + $0x90] sm:$0xff]  ;;  %s520_s9 = sshll.u32 %s202_s8, 4  ;;  %s1117_s21 = scalar_lea.sflag [#allocation4], %s200_s26  ;;  %s1110_s9 = int_to_ptr.vmem [resolvable:$true] %s520_s9 }
  0x3d   : > { %s1091_s29 = scalar_lea.vmem %s1163_s0, %s784_s4  ;;  %733 = vmatprep.subr.bf16.mxu1 %v732_v11  ;;  %v744_v25 = vpack.c.bf16 %v233_v23, %v232_v22  ;;  %v222_v26 = vld [vmem:[#allocation2 + $0x40] sm:$0xff]  ;;  %v402_v28 = vld [vmem:[#allocation2 + $0x98] sm:$0xff]  ;;  %v404_v30 = vld [vmem:[#allocation2 + $0xa8] sm:$0xff]  ;;  %s883_s15 = scalar_lea.vmem %s1110_s9, 256 }
  0x3e   : > { %v212_v10 = vld [vmem:[%s1091_s29] sm:$0xff]  ;;  %735 = vmatpush3.bf16.msra.mxu1 %v732_v11  ;;  %v403_v29 = vld [vmem:[#allocation2 + $0xa0] sm:$0xff]  ;;  %v764_v31 = vpack.c.bf16 %v402_v28, %v401_v27  ;;  %v234_v32 = vld [vmem:[#allocation2 + $0x88] sm:$0xff]  ;;  %p884_p8 = scmp.ne.s32.totalorder %s1110_s9, %s883_s15  ;;  %p1178_p10 = scmp.ne.s32.totalorder %s1171_s22, 0 }
  0x3f   : > { %708 = vmatprep.mubr.msk.f32.mxu0 %vm235_vm0, %v212_v10  ;;  %755 = vmatpush3.bf16.msra.mxu0 %v752_v5  ;;  %v223_v24 = vld [vmem:[%s1091_s29 + $0x1] sm:$0xff]  ;;  %v768_v34 = vpack.c.bf16 %v404_v30, %v403_v29  ;;  %v224_v38 = vld [vmem:[%s1091_s29 + $0x9] sm:$0xff]  ;;  %v408_v41 = vld [vmem:[#allocation2 + $0xc8] sm:$0xff]  ;;  %s970_s23 = smov [#allocation5]  }
  0x40   : > { %737 = vmatprep.subr.bf16.mxu1 %v736_v17  ;;  %757 = vmatprep.subr.bf16.mxu0 %v756_v12  ;;  %v213_v33 = vld [vmem:[%s1091_s29 + $0x8] sm:$0xff]  ;;  %v405_v36 = vld [vmem:[#allocation2 + $0xb0] sm:$0xff]  ;;  %v407_v40 = vld [vmem:[#allocation2 + $0xc0] sm:$0xff]  ;;  %p885_p11 = pnand %p884_p8, %p1178_p10  ;;  %s887_s28 = sshll.u32 %s970_s23, 4  ;;  %s888_s28 = int_to_ptr.vmem [resolvable:$false] %s887_s28 }
  0x41   : > { %687 = vmatprep.mubr.msk.f32.mxu1 %vm235_vm0, %v223_v24  ;;  %v398_v35 = vld [vmem:[%s1091_s29 + $0x2] sm:$0xff]  ;;  %v776_v42 = vpack.c.bf16 %v408_v41, %v407_v40  ;;  %v399_v44 = vld [vmem:[%s1091_s29 + $0xa] sm:$0xff]  ;;  %v629_v48 = vld [vmem:[%s1165_s2] ss:$0 sm:$0xff]  ;;  %s889_s4 = scalar_lea.vmem %s888_s28, 512  ;;  %p890_p1 = scmp.lt.s32.totalorder %s1110_s9, %s888_s28 }
  0x42   : > { %739 = vmatpush3.bf16.msra.mxu1 %v736_v17  ;;  %v406_v37 = vld [vmem:[#allocation2 + $0xb8] sm:$0xff]  ;;  %v409_v43 = vld [vmem:[#allocation2 + $0xd0] sm:$0xff]  ;;  %p886_p13 = pneg %p885_p11  ;;  %p891_p3 = scmp.lt.s32.totalorder %s889_s4, %s883_s15 }
  0x43   : > { %759 = vmatpush3.bf16.msra.mxu0 %v756_v12  ;;  %741 = vmatprep.subr.bf16.mxu1 %v740_v20  ;;  %v772_v39 = vpack.c.bf16 %v406_v37, %v405_v36 }
  0x44   : > { %761 = vmatprep.subr.bf16.mxu0 %v760_v21  ;;  %p892_p5 = por %p891_p3, %p890_p1 }
  0x46   : > { %743 = vmatpush3.bf16.msra.mxu1 %v740_v20  ;;  %p893_p6 = pnand %p892_p5, %p886_p13 }
  0x47   : > { %763 = vmatpush3.bf16.msra.mxu0 %v760_v21  ;;  %745 = vmatprep.subr.bf16.mxu1 %v744_v25 }
  0x48   : > { %706 = vmatprep.subr.mxu0 %v222_v26 }
  0x4a   : > { %747 = vmatpush3.bf16.msra.mxu1 %v744_v25 }
  0x4b   : > { %707 = vmatpush3.msra.mxu0 %v222_v26  ;;  %685 = vmatprep.subr.mxu1 %v234_v32 }
  0x4c   : > { %765 = vmatprep.subr.bf16.mxu0 %v764_v31  ;;  %709 = vmatmul.mubr.msk.f32.vlgmr.msra.gmra.mrb[0].mxu0 %vm235_vm0, %v213_v33 }
  0x4d   : > { %767 = vmatpush3.bf16.msra.mxu0 %v764_v31  ;;  %729 = vmatprep.mubr.msk.f32.mxu0 %vm235_vm0, %v398_v35 }
  0x4e   : > { %769 = vmatprep.subr.bf16.mxu0 %v768_v34  ;;  %686 = vmatpush3.msra.mxu1 %v234_v32 }
  0x4f   : > { %688 = vmatmul.mubr.msk.f32.vlgmr.msra.gmra.mrb[0].mxu1 %vm235_vm0, %v224_v38 }
  0x51   : > { %771 = vmatpush3.bf16.msra.mxu0 %v768_v34 }
  0x52   : > { %773 = vmatprep.subr.bf16.mxu0 %v772_v39 }
  0x55   : > { %775 = vmatpush3.bf16.msra.mxu0 %v772_v39 }
  0x56   : > { %777 = vmatprep.subr.bf16.mxu0 %v776_v42 }
  0x59   : > { %779 = vmatpush3.bf16.msra.mxu0 %v776_v42 }
  0x5a   : > { %727 = vmatprep.subr.mxu0 %v409_v43 }
  0x5d   : > { %728 = vmatpush3.msra.mxu0 %v409_v43 }
  0x5e   : > { %730 = vmatmul.mubr.msk.f32.vlgmr.msra.gmra.mrb[0].mxu0 %vm235_vm0, %v399_v44 }
 0x122   : > { %v689_v45 = vpop.f32.mrb[0].mxu1 }
 0x123   : > { %v308_v46 = vpop.f32.mrb[1].mxu1 }
 0x131   : > { %v731_v47 = vpop.f32.mrb[0].mxu0 }
 0x132   : > { %v780_v49 = vadd.f32 %v731_v47, %v689_v45  ;;  %v482_v50 = vpop.f32.mrb[1].mxu0 }
 0x133   : > { %v781_v51 = vadd.f32 %v482_v50, %v308_v46 }
 0x134   : > { %v501_v52 = vadd.f32 %v780_v49, %v629_v48 }
 0x135   : > { %v500_v53 = vadd.f32 %v781_v51, %v629_v48 }
 0x136   : > { %503 = vst [vmem:[%s202_s8 + $0x8] sm:$0xff] %v501_v52 }
 0x137   : > { %502 = vst [vmem:[%s202_s8] sm:$0xff] %v500_v53 }
 0x138   : > { %896 = shalt.err (!%p893_p6)
}
 0x139   : > { %s897_s30 = scalar_lea.hbm %s1115_s19, 256  ;;  %s901_s26 = scalar_lea.hbm %s1166_s3, 512 }
 0x13a   : > { %p898_p7 = scmp.ne.s32.totalorder %s1115_s19, %s897_s30  ;;  %p902_p0 = scmp.lt.u32.totalorder %s1115_s19, %s1166_s3 }
 0x13b   : > { %p903_p2 = scmp.lt.u32.totalorder %s901_s26, %s897_s30  ;;  %p905_p8 = scmp.lt.u32.totalorder %s897_s30, %s1115_s19 }
 0x13c   : > { %p899_p9 = pnand %p898_p7, %p1178_p10 }
 0x13d   : > { %p904_p4 = por %p903_p2, %p902_p0 }
 0x13e   : > { %p900_p12 = pneg %p899_p9 }
 0x13f   : > { %p906_p11 = por %p905_p8, %p904_p4 }
 0x141   : > { %p907_p13 = pnand %p906_p11, %p900_p12 }
 0x143   : > { %910 = shalt.err (!%p907_p13)
}
 0x144   : > { %s971_s7 = smov 128   ;;  %s972_s8 = smov 8  }
 0x145   : > { %789 = dma.vmem_to_hbm [thread:$0]  (%p1178_p10), %s1110_s9, 256, %s1115_s19, %s1117_s21, %s971_s7, %s971_s7, %s972_s8  }
 0x146 PF: > { %p801_p1 = scmp.ge.s32.totalorder %s965_s17, 2  ;;  %s535_s10 = sand.u32 1, %s945_s12  }
 0x147   : > { %p1179_p3 = scmp.ne.s32.totalorder %s1172_s24, 0  ;;  %s536_s11 = scalar_lea.sflag [#allocation4], %s535_s10 }
 0x149   : > { %p796_p5 = pnand %p801_p1, %p1179_p3 }
 0x14b   : > { %940 = dma.done.wait (!%p796_p5), %s536_s11, 256  }
 0x14c   : > { %942 = vsyncadd (!%p796_p5), %s536_s11, 4294967040  ;;  %s17_s17 = sadd.s32 1, %s965_s17   ;;  %s1180_s12 = smov %s949_s13 }
 0x14d   : > { %p14_p6 = scmp.ge.s32.totalorder %s17_s17, 4   ;;  %s1181_s13 = smov %s953_s14 }
 0x14e   : > { %s1182_s14 = smov %s1046_s25  ;;  %s1183_s15 = smov %s961_s16 }
 0x14f   : > { %s1184_s16 = smov %s1186_s20  ;;  %16 = sbr.rel (!%p14_p6) target bundleno = 5 (0x5), region = 74 }
 0x156   :  { %541 = vsyncpa [#allocation3], 1 }
 0x157   :  { %543 = vsyncpa [#allocation3 + $0x1], 1 }
 0x158   :  { %544 = vsyncpa [#allocation4], 1 }
 0x159   :  { %546 = vsyncpa [#allocation4 + $0x1], 1 }

</bundles_post_ra>
